<compile_context>
chip_gen: v7x
topology: tpu7x:2x2x1
jax: 0.10.0
libtpu: 0.0.40
codegen_flags: <defaults>
</compile_context>

<pallas_src>
import jax
import jax.numpy as jnp
from jax.experimental import pallas as pl
from jax.experimental.pallas import tpu as pltpu

EPS = 1e-8


def _kernel(o1_ref, o2_ref, label_ref, out_ref):
    o1 = o1_ref[...].astype(jnp.float32)          # (TB, D)
    o2 = o2_ref[...].astype(jnp.float32)          # (TB, D)
    label = label_ref[...].astype(jnp.float32)    # (TB, 1)

    # Per-row reductions over the feature (lane) axis.
    dot = jnp.sum(o1 * o2, axis=-1, keepdims=True)   # (TB, 1)
    s1 = jnp.sum(o1 * o1, axis=-1, keepdims=True)
    s2 = jnp.sum(o2 * o2, axis=-1, keepdims=True)

    # cos = dot / max(||o1||*||o2||, eps) == dot * rsqrt(max(s1*s2, eps^2))
    cos = dot * jax.lax.rsqrt(jnp.maximum(s1 * s2, EPS * EPS))

    # -label*cos + (1-label)*relu(cos)  ==  relu(cos) - label*(cos + relu(cos))
    # (beta and 1/B are folded into a single scale in the JAX wrapper.)
    relu_cos = jnp.maximum(cos, 0.0)
    out_ref[...] = relu_cos - label * (cos + relu_cos)


def cosine_contrastive_loss(output1, output2, label, beta=1.0, block_b=None):
    """Pallas wrapper. output1/output2: (B, D); label: (B,). Returns a scalar."""
    B, D = output1.shape
    label2d = label.reshape(B, 1).astype(jnp.float32)

    itemsize = jnp.dtype(output1.dtype).itemsize
    if block_b is None:
        # Target ~8 MiB of (output1 + output2) input bytes per grid step; with
        # double-buffering that is ~16 MiB of VMEM. Dtype-aware so bf16 inputs
        # get twice the rows per step for the same byte budget.
        input_budget = 8 * 1024 * 1024
        tb = input_budget // (2 * D * itemsize)
        tb = max(8, min(8192, (tb // 8) * 8))
    else:
        tb = int(block_b)

    if tb >= B:
        tb = B                          # one full-extent block (always legal)
    else:
        tb = max(8, (tb // 8) * 8)      # (8, 128) tiling constraint

    num_blocks = pl.cdiv(B, tb)

    # Scoped-VMEM budget: 2 big inputs x 2 pipeline buffers x tile, plus the
    # (tiny) label and per-row-output tiles. Explicitly > 16 MiB for v5e's
    # small scoped default, <= 32 MiB for v7x.
    needed = 2 * (2 * tb * D * itemsize + 2 * tb * 4)
    vmem_limit = int(min(96 * 1024 * 1024,
                         max(32 * 1024 * 1024, needed + (2 << 20))))

    per_row = pl.pallas_call(
        _kernel,
        out_shape=jax.ShapeDtypeStruct((B, 1), jnp.float32),
        grid_spec=pltpu.PrefetchScalarGridSpec(
            num_scalar_prefetch=0,
            grid=(num_blocks,),
            in_specs=[
                pl.BlockSpec((tb, D), lambda i: (i, 0)),
                pl.BlockSpec((tb, D), lambda i: (i, 0)),
                pl.BlockSpec((tb, 1), lambda i: (i, 0)),
            ],
            # Each grid step owns a disjoint output slab -> no cross-step
            # dependency, so the batch axis can be 'parallel' (v7x megacore).
            out_specs=pl.BlockSpec((tb, 1), lambda i: (i, 0)),
        ),
        compiler_params=pltpu.CompilerParams(
            dimension_semantics=("parallel",),
            vmem_limit_bytes=vmem_limit,
        ),
    )(output1, output2, label2d)

    # Tiny final reduction; fold beta and 1/B into one scale.
    return jnp.sum(per_row) * (float(beta) / float(B))


def _reference(output1, output2, label, beta=1.0):
    o1 = output1.astype(jnp.float32)
    o2 = output2.astype(jnp.float32)
    dot = jnp.sum(o1 * o2, axis=1)
    n1 = jnp.linalg.norm(o1, axis=1)
    n2 = jnp.linalg.norm(o2, axis=1)
    cos = dot / jnp.maximum(n1 * n2, EPS)
    return jnp.mean(-label * beta * cos + (1.0 - label) * beta * jnp.clip(cos, 0.0))


if __name__ == "__main__":
    key = jax.random.PRNGKey(0)
    k1, k2, k3 = jax.random.split(key, 3)

    B, D = 20, 128
    output1 = jax.random.normal(k1, (B, D), dtype=jnp.float32)
    output2 = jax.random.normal(k2, (B, D), dtype=jnp.float32)
    label = jax.random.bernoulli(k3, 0.5, (B,)).astype(jnp.float32)

    # Multi-block path: 3 grid steps, last block partial (dropped OOB rows).
    ref = _reference(output1, output2, label)
    loss_tiled = cosine_contrastive_loss(output1, output2, label, block_b=8)
    jax.block_until_ready(loss_tiled)
    assert jnp.allclose(loss_tiled, ref, atol=1e-5, rtol=1e-5), (loss_tiled, ref)

    # Auto-tiled path (single full-extent block at this small size).
    loss_auto = cosine_contrastive_loss(output1, output2, label)
    jax.block_until_ready(loss_auto)
    assert jnp.allclose(loss_auto, ref, atol=1e-5, rtol=1e-5), (loss_auto, ref)

    # beta folding check.
    ref_b = _reference(output1, output2, label, beta=2.5)
    loss_b = cosine_contrastive_loss(output1, output2, label, beta=2.5, block_b=8)
    jax.block_until_ready(loss_b)
    assert jnp.allclose(loss_b, ref_b, atol=1e-5, rtol=1e-5), (loss_b, ref_b)

    print("KERNEL_OK")
</pallas_src>

<mosaic_0001>
module attributes {stable_mosaic.version = 11 : i64} {
  func.func @_kernel(%arg0: i32, %arg1: memref<8x128xf32, #tpu.memory_space<vmem>>, %arg2: memref<8x128xf32, #tpu.memory_space<vmem>>, %arg3: memref<8x1xf32, #tpu.memory_space<vmem>>, %arg4: memref<8x1xf32, #tpu.memory_space<vmem>>) attributes {dimension_semantics = [#tpu.dimension_semantics<parallel>], iteration_bounds = array<i64: 3>, scalar_prefetch = 0 : i64, scratch_operands = 0 : i64, tpu.core_type = #tpu.core_type<tc>, window_params = [{transform_indices = @transform_0, window_bounds = array<i64: 8, 128>}, {transform_indices = @transform_1, window_bounds = array<i64: 8, 128>}, {transform_indices = @transform_2, window_bounds = array<i64: 8, 1>}, {transform_indices = @transform_3, window_bounds = array<i64: 8, 1>}]} {
    %c0 = arith.constant 0 : index
    %c0_0 = arith.constant 0 : index
    %0 = vector.load %arg1[%c0, %c0_0] : memref<8x128xf32, #tpu.memory_space<vmem>>, vector<8x128xf32>
    %c0_1 = arith.constant 0 : index
    %c0_2 = arith.constant 0 : index
    %1 = vector.load %arg2[%c0_1, %c0_2] : memref<8x128xf32, #tpu.memory_space<vmem>>, vector<8x128xf32>
    %c0_3 = arith.constant 0 : index
    %c0_4 = arith.constant 0 : index
    %2 = vector.load %arg3[%c0_3, %c0_4] : memref<8x1xf32, #tpu.memory_space<vmem>>, vector<8x1xf32>
    %3 = arith.mulf %0, %1 : vector<8x128xf32>
    %cst = arith.constant dense<0.000000e+00> : vector<8xf32>
    %4 = vector.multi_reduction <add>, %3, %cst [1] : vector<8x128xf32> to vector<8xf32>
    %5 = vector.shape_cast %4 : vector<8xf32> to vector<8x1xf32>
    %6 = arith.mulf %0, %0 : vector<8x128xf32>
    %cst_5 = arith.constant dense<0.000000e+00> : vector<8xf32>
    %7 = vector.multi_reduction <add>, %6, %cst_5 [1] : vector<8x128xf32> to vector<8xf32>
    %8 = vector.shape_cast %7 : vector<8xf32> to vector<8x1xf32>
    %9 = arith.mulf %1, %1 : vector<8x128xf32>
    %cst_6 = arith.constant dense<0.000000e+00> : vector<8xf32>
    %10 = vector.multi_reduction <add>, %9, %cst_6 [1] : vector<8x128xf32> to vector<8xf32>
    %11 = vector.shape_cast %10 : vector<8xf32> to vector<8x1xf32>
    %12 = arith.mulf %8, %11 : vector<8x1xf32>
    %cst_7 = arith.constant 1.000000e-16 : f32
    %13 = vector.broadcast %cst_7 : f32 to vector<8x1xf32>
    %14 = arith.maximumf %12, %13 : vector<8x1xf32>
    %15 = math.rsqrt %14 : vector<8x1xf32>
    %16 = arith.mulf %5, %15 : vector<8x1xf32>
    %cst_8 = arith.constant 0.000000e+00 : f32
    %17 = vector.broadcast %cst_8 : f32 to vector<8x1xf32>
    %18 = arith.maximumf %16, %17 : vector<8x1xf32>
    %19 = arith.addf %16, %18 : vector<8x1xf32>
    %20 = arith.mulf %2, %19 : vector<8x1xf32>
    %21 = arith.subf %18, %20 : vector<8x1xf32>
    %c0_9 = arith.constant 0 : index
    %c0_10 = arith.constant 0 : index
    %22 = vector.load %arg4[%c0_9, %c0_10] : memref<8x1xf32, #tpu.memory_space<vmem>>, vector<8x1xf32>
    tpu.vector_store %arg4[%c0_9, %c0_10], %21 {strides = array<i32>} : memref<8x1xf32, #tpu.memory_space<vmem>>, vector<8x1xf32>,
    return
  }
  func.func @transform_0(%arg0: i32) -> (i32, i32) {
    %c0_i32 = arith.constant 0 : i32
    %c0_i32_0 = arith.constant 0 : i32
    return %arg0, %c0_i32 : i32, i32
  }
  func.func @transform_1(%arg0: i32) -> (i32, i32) {
    %c0_i32 = arith.constant 0 : i32
    %c0_i32_0 = arith.constant 0 : i32
    return %arg0, %c0_i32 : i32, i32
  }
  func.func @transform_2(%arg0: i32) -> (i32, i32) {
    %c0_i32 = arith.constant 0 : i32
    %c0_i32_0 = arith.constant 0 : i32
    return %arg0, %c0_i32 : i32, i32
  }
  func.func @transform_3(%arg0: i32) -> (i32, i32) {
    %c0_i32 = arith.constant 0 : i32
    %c0_i32_0 = arith.constant 0 : i32
    return %arg0, %c0_i32 : i32, i32
  }
}

</mosaic_0001>

<bundles_post_ra>
// kernel: tpu_custom_call.1
= control target key start
LH: loop header
LB: loop body
LE: loop exit
PB: predicated region body
PF: predicated region fallthrough
CT: control target
= control target key end

     0   :  { %8 = vsyncpa [#allocation3], 0  ;;  %s584_s0 = inlined_call_operand.vmem [shape: f32[20,128], index: 0, kind: input, shape index: {}]   ;;  %s585_s1 = inlined_call_operand.hbm [shape: f32[20,128], index: 1, kind: input, shape index: {}]   ;;  %s586_s2 = inlined_call_operand.vmem [shape: f32[20,1], index: 2, kind: input, shape index: {}]   ;;  %s587_s3 = inlined_call_operand.vmem [shape: f32[20,1], index: 3, kind: output, shape index: {}]  }
   0x1   :  { %10 = vsyncpa [#allocation3 + $0x1], 0  ;;  %s471_s12 = smov 0   ;;  %s473_s13 = smov 0  }
   0x2   :  { %s475_s14 = smov 0   ;;  %s477_s15 = smov 0  }
   0x3 LB: > { %s490_s16 = sadd.s32 4294967295, %s448_s15   ;;  %s493_s17 = sadd.s32 1, %s448_s15   ;;  %s448_s15 = sphi %s477_s15, %s595_s15   ;;  %s444_s14 = sphi %s475_s14, %s594_s14   ;;  %s440_s13 = sphi %s473_s13, %s593_s13   ;;  %s436_s12 = sphi %s471_s12, %s592_s12  }
   0x4   : > { %s46_s18 = ssub.s32 %s448_s15, %s493_s17  ;;  %s49_s19 = sadd.s32 1, %s444_s14 }
   0x5   : > { %p47_p0 = scmp.eq.s32.totalorder %s46_s18, 0  ;;  %p56_p1 = scmp.ne.s32.totalorder %s444_s14, %s440_s13 }
   0x6   : > { %p57_p2 = scmp.eq.s32.totalorder %s448_s15, 0  ;;  %p62_p3 = scmp.ne.s32.totalorder %s440_s13, %s436_s12 }
   0x7   : > { %s503_s20 = scalar_select %p47_p0, %s444_s14, %s49_s19  }
   0x8   : > { %p58_p4 = por %p57_p2, %p56_p1  ;;  %p63_p5 = scmp.eq.s32.totalorder %s490_s16, 0 }
   0x9   : > { %p349_p6 = scmp.lt.s32.totalorder %s448_s15, 3  ;;  %s145_s22 = sand.u32 1, %s444_s14  }
   0xa   : > { %p507_p7 = por %p63_p5, %p62_p3  ;;  %s334_s23 = sshll.u32 %s145_s22, 3 }
   0xb   : > { %s335_s24 = sshll.u32 %s448_s15, 7  ;;  %s149_s28 = scalar_lea.vmem [#allocation2], %s334_s23 }
   0xc   : > { %s516_s27 = scalar_lea.hbm %s585_s1, %s335_s24  ;;  %s156_s29 = sshll.u32 %s149_s28, 4  ;;  %s518_s29 = int_to_ptr.vmem [resolvable:$true] %s156_s29 }
   0xd   : > { %p520_p8 = pnand %p349_p6, %p58_p4  ;;  %s146_s4 = scalar_lea.sflag [#allocation3], %s145_s22 }
   0xe   : > { %s384_s5 = scalar_lea.hbm %s516_s27, 128  ;;  %s389_s8 = scalar_lea.hbm %s585_s1, 384 }
   0xf   : > { %p385_p11 = scmp.ne.s32.totalorder %s516_s27, %s384_s5  ;;  %p386_p12 = pneg %p520_p8 }
  0x10   : > { %p390_p1 = scmp.lt.u32.totalorder %s516_s27, %s585_s1  ;;  %p391_p2 = scmp.lt.u32.totalorder %s389_s8, %s384_s5 }
  0x11   : > { %p387_p13 = pnand %p386_p12, %p385_p11  ;;  %p393_p4 = scmp.lt.u32.totalorder %s384_s5, %s516_s27 }
  0x12   : > { %p392_p3 = por %p391_p2, %p390_p1 }
  0x13   : > { %p388_p0 = pneg %p387_p13 }
  0x14   : > { %p394_p5 = por %p393_p4, %p392_p3 }
  0x16   : > { %p395_p6 = pnand %p394_p5, %p388_p0 }
  0x18   : > { %398 = shalt.err (!%p395_p6)
}
  0x19   : > { %s399_s11 = scalar_lea.vmem %s518_s29, 128  ;;  %s450_s12 = smov [#allocation2]  }
  0x1a   : > { %p400_p11 = scmp.ne.s32.totalorder %s518_s29, %s399_s11  ;;  %s404_s18 = sshll.u32 %s450_s12, 4  ;;  %s405_s18 = int_to_ptr.vmem [resolvable:$false] %s404_s18 }
  0x1b   : > { %s406_s19 = scalar_lea.vmem %s405_s18, 256  ;;  %p407_p10 = scmp.lt.s32.totalorder %s518_s29, %s405_s18 }
  0x1c   : > { %p402_p13 = pnand %p400_p11, %p386_p12  ;;  %p408_p1 = scmp.lt.s32.totalorder %s406_s19, %s399_s11 }
  0x1e   : > { %p403_p9 = pneg %p402_p13  ;;  %p409_p2 = por %p408_p1, %p407_p10 }
  0x20   : > { %p410_p3 = pnand %p409_p2, %p403_p9 }
  0x22   : > { %413 = shalt.err (!%p410_p3)
}
  0x23   : > { %348 = dma.hbm_to_vmem [thread:$0]  (!%p520_p8), %s516_s27, 128, %s518_s29, %s146_s4  }
  0x24   : > { %p590_p0 = scmp.lt.s32.totalorder %s448_s15, 4  ;;  %p591_p4 = scmp.ge.s32.totalorder %s448_s15, 1 }
  0x26   : > { %p169_p12 = pnand %p591_p4, %p590_p0 }
  0x27   : > { %s174_s22 = sand.u32 (!%p169_p12), 1, %s440_s13  }
  0x28   : > { %172 = sbr.rel (%p169_p12) target bundleno = 228 (0xe4), region = 32  ;;  %s337_s23 = sshll.u32 (!%p169_p12), %s174_s22, 3 }
  0x29   : > { %s175_s24 = scalar_lea.sflag (!%p169_p12), [#allocation3], %s174_s22  ;;  %s178_s25 = scalar_lea.vmem (!%p169_p12), [#allocation2], %s337_s23 }
  0x2f   : > { %431 = dma.done.wait (%p507_p7), %s175_s24, 128  }
  0x30   : > { %433 = vsyncadd (%p507_p7), %s175_s24, 4294967168  ;;  %p208_p9 = scmp.lt.s32.totalorder %s490_s16, 2  ;;  %v221_v1 = vld [vmem:[%s178_s25] sm:$0xff]  ;;  %vm240_vm0 = vcmask 7168  }
  0x31   : > { %v229_v4 = vmul.f32 %v221_v1, %v221_v1 }
  0x32   : > { %s597_s16 = smov (!%p208_p9, %s490_s16), 2 }
  0x33   : > { %s338_s26 = sshll.u32 %s597_s16, 3 }
  0x34   : > { %s211_s28 = scalar_lea.vmem %s584_s0, %s338_s26  ;;  %s215_s29 = scalar_lea.vmem %s586_s2, %s338_s26 }
  0x35   : > { %v220_v0 = vld [vmem:[%s211_s28] sm:$0xff]  ;;  %s219_s5 = scalar_lea.vmem %s587_s3, %s338_s26 }
  0x36   : > { %v226_v2 = vmul.f32 %v220_v0, %v220_v0  ;;  %v223_v3 = vmul.f32 %v221_v1, %v220_v0  ;;  %v222_v13 = vld [vmem:[%s215_s29] sm:$0xff] }
  0x38   : > { %227 = vadd.xlane.f32.xlu0 %v226_v2  ;;  %224 = vadd.xlane.f32.xlu1 %v223_v3 }
  0x3c   : > { %230 = vadd.xlane.f32.xlu0 %v229_v4 }
  0xc5   : > { %v228_v5 = vpop.xlane.xlu0 %227  ;;  %v225_v9 = vpop.xlane.xlu1 %224 }
  0xc9   : > { %v231_v6 = vpop.xlane.xlu0 %230 }
  0xca   : > { %v232_v7 = vmul.f32 %v231_v6, %v228_v5 }
  0xcc   : > { %v233_v8 = vmax.f32 %v232_v7, 1e-16 }
  0xce   : > { %382 = vrsqrt.f32 %v233_v8 }
  0xd8   : > { %v383_v10 = vpop.eup %382 }
  0xd9   : > { %v235_v11 = vmul.f32 %v383_v10, %v225_v9 }
  0xdb   : > { %v236_v12 = vmax.f32 %v235_v11, 0.0 }
  0xdd   : > { %v237_v14 = vadd.f32 %v236_v12, %v235_v11 }
  0xdf   : > { %v238_v15 = vmul.f32 %v237_v14, %v222_v13 }
  0xe1   : > { %v239_v16 = vsub.f32 %v236_v12, %v238_v15 }
  0xe3   : > { %241 = vst.msk [vmem:[%s219_s5] sm:$0xff] %vm240_vm0, %v239_v16 }
  0xe4 PF: > { %p13_p7 = scmp.ge.s32.totalorder %s493_s17, 5   ;;  %s592_s12 = smov %s440_s13 }
  0xe5   : > { %s593_s13 = smov %s444_s14  ;;  %s594_s14 = smov %s503_s20 }
  0xe6   : > { %s595_s15 = smov %s493_s17  ;;  %15 = sbr.rel (!%p13_p7) target bundleno = 3 (0x3), region = 78 }
  0xed   :  { %261 = vsyncpa [#allocation3], 1 }
  0xee   :  { %263 = vsyncpa [#allocation3 + $0x1], 1 }

</bundles_post_ra>
